<compile_context>
chip_gen: v7x
topology: tpu7x:2x2x1
jax: 0.10.0
libtpu: 0.0.40
codegen_flags: <defaults>
</compile_context>

<pallas_src>
import numpy as np
import jax
import jax.numpy as jnp
from jax.experimental import pallas as pl
from jax.experimental.pallas import tpu as pltpu


def _gat_agg_kernel(adj_t_ref, feat_ref, w_ref, out_ref, acc_ref):
    k = pl.program_id(1)

    @pl.when(k == 0)
    def _():
        acc_ref[...] = jnp.zeros_like(acc_ref)

    # acc[row-tile, :fin] += adj^T[row-tile, k-tile] @ feat[k-tile, :fin]
    acc_ref[...] += jnp.dot(adj_t_ref[...], feat_ref[...],
                            preferred_element_type=jnp.float32)

    @pl.when(k == pl.num_programs(1) - 1)
    def _():
        # Apply W once per output row tile: out = (adj^T @ feat) @ W.
        out_ref[...] = jnp.dot(acc_ref[...], w_ref[...],
                               preferred_element_type=jnp.float32
                               ).astype(out_ref.dtype)


def gat_layer(adj, feat, W, al=None, ar=None, *, tm=128, tk=128):
    """Effective GATLayer forward: adj^T @ (feat @ W).

    # TODO(synk): the leaky_relu/softmax edge-attention path (al, ar) only
    # mutates DGL graph edge state after the aggregation in the original
    # forward and never influences the returned node features, so it is
    # intentionally not computed here.
    """
    del al, ar
    N, fin = feat.shape
    fout = W.shape[1]
    tm = min(tm, N)
    tk = min(tk, N)
    assert N % tm == 0 and N % tk == 0, "N must be divisible by the tile sizes"

    # Natural (contracting-dim-last) layout + bf16 stream for the O(N^2) adj.
    # Transpose is a no-op for the symmetric-normalized adjacency but keeps
    # the update_all semantics (sum over source nodes u of adj[u, v] * h[u]).
    adj_t = adj.T.astype(jnp.bfloat16)
    feat_b = feat.astype(jnp.bfloat16)
    W = W.astype(jnp.float32)

    cost = pl.CostEstimate(
        flops=2 * N * N * fin + 2 * N * fin * fout,
        transcendentals=0,
        bytes_accessed=N * N * 2 + N * fin * 2 + fin * fout * 4 + N * fout * 4,
    )

    return pl.pallas_call(
        _gat_agg_kernel,
        out_shape=jax.ShapeDtypeStruct((N, fout), jnp.float32),
        grid_spec=pltpu.PrefetchScalarGridSpec(
            num_scalar_prefetch=0,
            grid=(N // tm, N // tk),
            in_specs=[
                pl.BlockSpec((tm, tk), lambda i, k: (i, k)),      # adj^T tile
                pl.BlockSpec((tk, fin), lambda i, k: (k, 0)),     # feat tile
                pl.BlockSpec((fin, fout), lambda i, k: (0, 0)),   # W (resident)
            ],
            out_specs=pl.BlockSpec((tm, fout), lambda i, k: (i, 0)),
            scratch_shapes=[pltpu.VMEM((tm, fin), jnp.float32)],
        ),
        compiler_params=pltpu.CompilerParams(
            dimension_semantics=("parallel", "arbitrary")),
        cost_estimate=cost,
    )(adj_t, feat_b, W)


def make_normalized_adj(key, n):
    """Dense symmetric-normalized adjacency with self loops (pre_adj equivalent)."""
    a = (jax.random.uniform(key, (n, n)) < 0.1).astype(jnp.float32)
    a = jnp.maximum(a, a.T)                    # symmetrize
    a = a + jnp.eye(n, dtype=jnp.float32)      # add self loops
    rowsum = a.sum(axis=1)
    d_inv_sqrt = jnp.where(rowsum > 0, rowsum ** -0.5, 0.0)
    return (a * d_inv_sqrt[None, :]) * d_inv_sqrt[:, None]


if __name__ == "__main__":
    N, IN_FEATS, OUT_FEATS = 256, 32, 16

    key = jax.random.PRNGKey(0)
    k_adj, k_feat, k_w, k_al, k_ar = jax.random.split(key, 5)

    adj = make_normalized_adj(k_adj, N)
    feat = jax.random.normal(k_feat, (N, IN_FEATS), dtype=jnp.float32)

    # Parameters matching nn.Parameter(torch.randn(...)) shapes.
    W = jax.random.normal(k_w, (IN_FEATS, OUT_FEATS), dtype=jnp.float32)
    al = jax.random.normal(k_al, (IN_FEATS, 1), dtype=jnp.float32)
    ar = jax.random.normal(k_ar, (IN_FEATS, 1), dtype=jnp.float32)

    out = gat_layer(adj, feat, W, al, ar, tm=128, tk=128)  # grid = (2, 2)
    out = jax.block_until_ready(out)

    # Pure-numpy reference of the effective forward, with adj/feat quantized
    # to bf16 exactly as the kernel streams them (f32 accumulation both sides).
    adj_q = np.asarray(adj.astype(jnp.bfloat16).astype(jnp.float32))
    feat_q = np.asarray(feat.astype(jnp.bfloat16).astype(jnp.float32))
    ref = (adj_q.T @ feat_q) @ np.asarray(W)
    np.testing.assert_allclose(np.asarray(out), ref, rtol=2e-3, atol=2e-3)

    print("KERNEL_OK")
</pallas_src>

<mosaic_0001>
module attributes {stable_mosaic.version = 11 : i64} {
  func.func @_gat_agg_kernel(%arg0: i32, %arg1: i32, %arg2: memref<128x128xbf16, #tpu.memory_space<vmem>>, %arg3: memref<128x32xbf16, #tpu.memory_space<vmem>>, %arg4: memref<32x16xf32, #tpu.memory_space<vmem>>, %arg5: memref<128x16xf32, #tpu.memory_space<vmem>>, %arg6: memref<128x32xf32, #tpu.memory_space<vmem>>) attributes {dimension_semantics = [#tpu.dimension_semantics<parallel>, #tpu.dimension_semantics<arbitrary>], iteration_bounds = array<i64: 2, 2>, scalar_prefetch = 0 : i64, scratch_operands = 1 : i64, tpu.core_type = #tpu.core_type<tc>, window_params = [{transform_indices = @transform_0, window_bounds = array<i64: 128, 128>}, {transform_indices = @transform_1, window_bounds = array<i64: 128, 32>}, {pipeline_mode = #tpu.pipeline_mode<synchronous>, transform_indices = @transform_2, window_bounds = array<i64: 32, 16>}, {transform_indices = @transform_3, window_bounds = array<i64: 128, 16>}]} {
    %c0_i32 = arith.constant 0 : i32
    %0 = arith.cmpi eq, %arg1, %c0_i32 : i32
    %1 = arith.extui %0 : i1 to i32
    %c0_i32_0 = arith.constant 0 : i32
    %2 = arith.cmpi ne, %1, %c0_i32_0 : i32
    scf.if %2 {
      %cst_9 = arith.constant 0.000000e+00 : f32
      %12 = vector.broadcast %cst_9 : f32 to vector<128x32xf32>
      %c0_10 = arith.constant 0 : index
      %c0_11 = arith.constant 0 : index
      %13 = vector.load %arg6[%c0_10, %c0_11] : memref<128x32xf32, #tpu.memory_space<vmem>>, vector<128x32xf32>
      tpu.vector_store %arg6[%c0_10, %c0_11], %12 {strides = array<i32>} : memref<128x32xf32, #tpu.memory_space<vmem>>, vector<128x32xf32>,
    } else {
    }
    %c0 = arith.constant 0 : index
    %c0_1 = arith.constant 0 : index
    %3 = vector.load %arg6[%c0, %c0_1] : memref<128x32xf32, #tpu.memory_space<vmem>>, vector<128x32xf32>
    %c0_2 = arith.constant 0 : index
    %c0_3 = arith.constant 0 : index
    %4 = vector.load %arg2[%c0_2, %c0_3] : memref<128x128xbf16, #tpu.memory_space<vmem>>, vector<128x128xbf16>
    %c0_4 = arith.constant 0 : index
    %c0_5 = arith.constant 0 : index
    %5 = vector.load %arg3[%c0_4, %c0_5] : memref<128x32xbf16, #tpu.memory_space<vmem>>, vector<128x32xbf16>
    %cst = arith.constant dense<0.000000e+00> : vector<128x32xf32>
    %6 = tpu.matmul %4, %5, %cst {dimension_numbers = #tpu.dot_dimension_numbers<[1], [0], [0], [1], [0, 0, 1, 1], [], []>} : vector<128x128xbf16>, vector<128x32xbf16>, vector<128x32xf32> -> vector<128x32xf32>
    %7 = arith.addf %3, %6 : vector<128x32xf32>
    %c0_6 = arith.constant 0 : index
    %c0_7 = arith.constant 0 : index
    %8 = vector.load %arg6[%c0_6, %c0_7] : memref<128x32xf32, #tpu.memory_space<vmem>>, vector<128x32xf32>
    tpu.vector_store %arg6[%c0_6, %c0_7], %7 {strides = array<i32>} : memref<128x32xf32, #tpu.memory_space<vmem>>, vector<128x32xf32>,
    %c1_i32 = arith.constant 1 : i32
    %9 = arith.cmpi eq, %arg1, %c1_i32 : i32
    %10 = arith.extui %9 : i1 to i32
    %c0_i32_8 = arith.constant 0 : i32
    %11 = arith.cmpi ne, %10, %c0_i32_8 : i32
    scf.if %11 {
      %c0_9 = arith.constant 0 : index
      %c0_10 = arith.constant 0 : index
      %12 = vector.load %arg6[%c0_9, %c0_10] : memref<128x32xf32, #tpu.memory_space<vmem>>, vector<128x32xf32>
      %c0_11 = arith.constant 0 : index
      %c0_12 = arith.constant 0 : index
      %13 = vector.load %arg4[%c0_11, %c0_12] : memref<32x16xf32, #tpu.memory_space<vmem>>, vector<32x16xf32>
      %cst_13 = arith.constant dense<0.000000e+00> : vector<128x16xf32>
      %14 = tpu.matmul %12, %13, %cst_13 {dimension_numbers = #tpu.dot_dimension_numbers<[1], [0], [0], [1], [0, 0, 1, 1], [], []>} : vector<128x32xf32>, vector<32x16xf32>, vector<128x16xf32> -> vector<128x16xf32>
      %c0_14 = arith.constant 0 : index
      %c0_15 = arith.constant 0 : index
      %15 = vector.load %arg5[%c0_14, %c0_15] : memref<128x16xf32, #tpu.memory_space<vmem>>, vector<128x16xf32>
      tpu.vector_store %arg5[%c0_14, %c0_15], %14 {strides = array<i32>} : memref<128x16xf32, #tpu.memory_space<vmem>>, vector<128x16xf32>,
    } else {
    }
    return
  }
  func.func @transform_0(%arg0: i32, %arg1: i32) -> (i32, i32) {
    %c0_i32 = arith.constant 0 : i32
    return %arg0, %arg1 : i32, i32
  }
  func.func @transform_1(%arg0: i32, %arg1: i32) -> (i32, i32) {
    %c0_i32 = arith.constant 0 : i32
    %c0_i32_0 = arith.constant 0 : i32
    return %arg1, %c0_i32 : i32, i32
  }
  func.func @transform_2(%arg0: i32, %arg1: i32) -> (i32, i32) {
    %c0_i32 = arith.constant 0 : i32
    %c0_i32_0 = arith.constant 0 : i32
    %c0_i32_1 = arith.constant 0 : i32
    return %c0_i32, %c0_i32_0 : i32, i32
  }
  func.func @transform_3(%arg0: i32, %arg1: i32) -> (i32, i32) {
    %c0_i32 = arith.constant 0 : i32
    %c0_i32_0 = arith.constant 0 : i32
    return %arg0, %c0_i32 : i32, i32
  }
}

</mosaic_0001>

<bundles_post_ra>
// kernel: tpu_custom_call.1
= control target key start
LH: loop header
LB: loop body
LE: loop exit
PB: predicated region body
PF: predicated region fallthrough
CT: control target
= control target key end

     0   :  { %8 = vsyncpa [#allocation4], 0  ;;  %s1517_s0 = inlined_call_operand.hbm [shape: bf16[256,256], index: 0, kind: input, shape index: {}]   ;;  %s1518_s1 = inlined_call_operand.vmem [shape: bf16[256,32], index: 1, kind: input, shape index: {}]   ;;  %s1519_s2 = inlined_call_operand.vmem [shape: f32[32,16], index: 2, kind: input, shape index: {}]   ;;  %s1520_s3 = inlined_call_operand.vmem [shape: f32[256,16], index: 3, kind: output, shape index: {}]  }
   0x1   :  { %10 = vsyncpa [#allocation4 + $0x1], 0  ;;  %s1247_s12 = smov 0   ;;  %s1249_s13 = smov 0  }
   0x2   :  { %s1251_s14 = smov 0   ;;  %s1253_s15 = smov 0  }
   0x3   :  { %s1255_s16 = smov 0   ;;  %s1257_s17 = smov 0  }
   0x4   :  { %s1259_s18 = smov 0   ;;  %s1261_s19 = smov 0  }
   0x5 LB: > { %s854_s20 = sadd.s32 4294967295, %s1220_s19   ;;  %s25_s21 = sadd.s32 1, %s1212_s17  ;;  %s1220_s19 = sphi %s1261_s19, %s16_s19   ;;  %s1216_s18 = sphi %s1259_s18, %s1531_s18   ;;  %s1212_s17 = sphi %s1257_s17, %s1530_s17   ;;  %s1208_s16 = sphi %s1255_s16, %s1529_s16   ;;  %s1204_s15 = sphi %s1253_s15, %s1528_s15   ;;  %s1200_s14 = sphi %s1251_s14, %s1527_s14   ;;  %s1196_s13 = sphi %s1249_s13, %s1526_s13   ;;  %s1192_s12 = sphi %s1247_s12, %s1525_s12  }
   0x6   : > { %p26_p0 = scmp.ge.s32.totalorder %s25_s21, 2  ;;  %s28_s22 = sadd.s32 1, %s1216_s18 }
   0x7   : > { %s37_s23 = sadd.s32 1, %s1200_s14  ;;  %p44_p1 = scmp.ne.s32.totalorder %s1200_s14, %s1196_s13 }
   0x8   : > { %s1533_s21 = smov (%p26_p0, %s25_s21), 0  ;;  %s1535_s22 = smov (!%p26_p0, %s28_s22), %s1216_s18 }
   0x9   : > { %s33_s24 = ssub.s32 %s1212_s17, %s1533_s21  ;;  %p45_p2 = scmp.eq.s32.totalorder %s1220_s19, 0 }
   0xa   : > { %p30_p3 = scmp.ge.s32.totalorder %s1535_s22, 2  ;;  %p50_p4 = scmp.ne.s32.totalorder %s1196_s13, %s1192_s12 }
   0xb   : > { %p1298_p5 = por %p45_p2, %p44_p1  ;;  %p51_p6 = scmp.eq.s32.totalorder %s854_s20, 0 }
   0xc   : > { %s1537_s22 = smov (%p30_p3, %s1535_s22), 0  ;;  %p1039_p8 = scmp.lt.s32.totalorder %s1220_s19, 4 }
   0xd   : > { %p1304_p7 = por %p51_p6, %p50_p4  ;;  %s32_s27 = ssub.s32 %s1216_s18, %s1537_s22 }
   0xe   : > { %s34_s28 = sor.u32 %s33_s24, %s32_s27  ;;  %s150_s29 = sand.u32 1, %s1200_s14  }
   0xf   : > { %p35_p9 = scmp.eq.s32.totalorder %s34_s28, 0  ;;  %s858_s30 = sshll.u32 %s150_s29, 6 }
  0x10   : > { %s904_s4 = sshll.u32 %s1216_s18, 5  ;;  %s154_s8 = scalar_lea.vmem [#allocation3], %s858_s30 }
  0x11   : > { %s1314_s5 = scalar_select %p35_p9, %s1200_s14, %s37_s23  }
  0x12   : > { %s160_s6 = sadd.s32 %s1212_s17, %s904_s4  ;;  %s163_s9 = sshll.u32 %s154_s8, 4  ;;  %s1322_s9 = int_to_ptr.vmem [resolvable:$true] %s163_s9 }
  0x13   : > { %s861_s7 = sshll.u32 %s160_s6, 6  ;;  %p1328_p10 = pnand %p1039_p8, %p1298_p5 }
  0x14   : > { %s1320_s12 = scalar_lea.hbm %s1517_s0, %s861_s7  ;;  %s1333_s23 = scalar_lea.sflag [#allocation4], %s150_s29 }
  0x15   : > { %s1124_s24 = scalar_lea.hbm %s1320_s12, 1024  ;;  %p1126_p13 = pneg %p1328_p10 }
  0x16   : > { %p1125_p12 = scmp.ne.s32.totalorder %s1320_s12, %s1124_s24  ;;  %s1129_s28 = scalar_lea.hbm %s1517_s0, 4096 }
  0x17   : > { %p1130_p2 = scmp.lt.u32.totalorder %s1320_s12, %s1517_s0  ;;  %p1131_p3 = scmp.lt.u32.totalorder %s1129_s28, %s1124_s24 }
  0x18   : > { %p1127_p0 = pnand %p1126_p13, %p1125_p12  ;;  %p1133_p5 = scmp.lt.u32.totalorder %s1124_s24, %s1320_s12 }
  0x19   : > { %p1132_p4 = por %p1131_p3, %p1130_p2 }
  0x1a   : > { %p1128_p1 = pneg %p1127_p0 }
  0x1b   : > { %p1134_p6 = por %p1133_p5, %p1132_p4 }
  0x1d   : > { %p1135_p8 = pnand %p1134_p6, %p1128_p1 }
  0x1f   : > { %1138 = shalt.err (!%p1135_p8)
}
  0x20   : > { %s1139_s29 = scalar_lea.vmem %s1322_s9, 1024  ;;  %s1222_s6 = smov [#allocation3]  }
  0x21   : > { %p1140_p9 = scmp.ne.s32.totalorder %s1322_s9, %s1139_s29  ;;  %s1144_s7 = sshll.u32 %s1222_s6, 4  ;;  %s1145_s7 = int_to_ptr.vmem [resolvable:$false] %s1144_s7 }
  0x22   : > { %s1146_s8 = scalar_lea.vmem %s1145_s7, 2048  ;;  %p1147_p11 = scmp.lt.s32.totalorder %s1322_s9, %s1145_s7 }
  0x23   : > { %p1142_p12 = pnand %p1140_p9, %p1126_p13  ;;  %p1148_p2 = scmp.lt.s32.totalorder %s1146_s8, %s1139_s29 }
  0x25   : > { %p1143_p0 = pneg %p1142_p12  ;;  %p1149_p3 = por %p1148_p2, %p1147_p11 }
  0x27   : > { %p1150_p4 = pnand %p1149_p3, %p1143_p0 }
  0x29   : > { %1153 = shalt.err (!%p1150_p4)
}
  0x2a   : > { %s1223_s10 = smov 128   ;;  %s1224_s11 = smov 64  }
  0x2b   : > { %s1225_s24 = smov 4   ;;  %p180_p13 = scmp.lt.s32.totalorder %s1220_s19, 5 }
  0x2c   : > { %1038 = dma.hbm_to_vmem [thread:$0]  (!%p1328_p10), %s1320_s12, 1024, %s1322_s9, %s1333_s23, %s1223_s10, %s1224_s11, %s1225_s24  }
  0x2d   : > { %p1524_p1 = scmp.ge.s32.totalorder %s1220_s19, 1 }
  0x2f   : > { %p181_p5 = pnand %p1524_p1, %p180_p13 }
  0x30   : > { %s186_s27 = sand.u32 (!%p181_p5), 1, %s1196_s13  }
  0x31   : > { %184 = sbr.rel (%p181_p5) target bundleno = 555 (0x22b), region = 32  ;;  %s863_s25 = sshll.u32 (!%p181_p5), %s186_s27, 6 }
  0x32   : > { %s187_s28 = scalar_lea.sflag (!%p181_p5), [#allocation4], %s186_s27  ;;  %s1365_s30 = scalar_lea.vmem (!%p181_p5), [#allocation3], %s863_s25 }
  0x38   : > { %1187 = dma.done.wait (%p1304_p7), %s187_s28, 1024  }
  0x39   : > { %1189 = vsyncadd (%p1304_p7), %s187_s28, 4294966272  ;;  %s864_s20 = sshll.u32 %s1204_s15, 4  ;;  %s866_s9 = sshll.u32 %s1208_s16, 4 }
  0x3a   : > { %p220_p10 = scmp.lt.s32.totalorder %s864_s20, 31  ;;  %p226_p11 = scmp.lt.s32.totalorder %s866_s9, 31 }
  0x3b   : > { %p868_p7 = scmp.ne.s32.totalorder %s1204_s15, 0 }
  0x3c   : > { %s1539_s20 = smov (!%p220_p10, %s864_s20), 31  ;;  %s1541_s9 = smov (!%p226_p11, %s866_s9), 31 }
  0x3d   : > { %s865_s12 = sshll.u32 %s1539_s20, 2  ;;  %s867_s6 = sshll.u32 %s1541_s9, 3  ;;  %vm236_vm0 = vcmask (!%p868_p7), 261120   ;;  %v1226_v0 = vmov (!%p868_p7), 0.0  }
  0x3e   : > { %s1376_s29 = scalar_lea.vmem %s1518_s1, %s865_s12  ;;  %s1381_s26 = scalar_lea.vmem %s1520_s3, %s867_s6  ;;  %237 = vst.msk [vmem:[#allocation2] sm:$0xff] (!%p868_p7), %vm236_vm0, %v1226_v0  ;;  %238 = vst.msk [vmem:[#allocation2 + $0x8] sm:$0xff] (!%p868_p7), %vm236_vm0, %v1226_v0 }
  0x3f   : > { %235 = sbr.rel (%p868_p7) target bundleno = 70 (0x46), region = 40  ;;  %239 = vst.msk [vmem:[#allocation2 + $0x10] sm:$0xff] (!%p868_p7), %vm236_vm0, %v1226_v0  ;;  %240 = vst.msk [vmem:[#allocation2 + $0x18] sm:$0xff] (!%p868_p7), %vm236_vm0, %v1226_v0 }
  0x40   : > { %241 = vst.msk [vmem:[#allocation2 + $0x20] sm:$0xff] (!%p868_p7), %vm236_vm0, %v1226_v0  ;;  %242 = vst.msk [vmem:[#allocation2 + $0x28] sm:$0xff] (!%p868_p7), %vm236_vm0, %v1226_v0 }
  0x41   : > { %243 = vst.msk [vmem:[#allocation2 + $0x30] sm:$0xff] (!%p868_p7), %vm236_vm0, %v1226_v0  ;;  %244 = vst.msk [vmem:[#allocation2 + $0x38] sm:$0xff] (!%p868_p7), %vm236_vm0, %v1226_v0 }
  0x42   : > { %245 = vst.msk [vmem:[#allocation2 + $0x40] sm:$0xff] (!%p868_p7), %vm236_vm0, %v1226_v0  ;;  %246 = vst.msk [vmem:[#allocation2 + $0x48] sm:$0xff] (!%p868_p7), %vm236_vm0, %v1226_v0 }
  0x43   : > { %247 = vst.msk [vmem:[#allocation2 + $0x50] sm:$0xff] (!%p868_p7), %vm236_vm0, %v1226_v0  ;;  %248 = vst.msk [vmem:[#allocation2 + $0x58] sm:$0xff] (!%p868_p7), %vm236_vm0, %v1226_v0 }
  0x44   : > { %249 = vst.msk [vmem:[#allocation2 + $0x60] sm:$0xff] (!%p868_p7), %vm236_vm0, %v1226_v0  ;;  %250 = vst.msk [vmem:[#allocation2 + $0x68] sm:$0xff] (!%p868_p7), %vm236_vm0, %v1226_v0 }
  0x45   : > { %251 = vst.msk [vmem:[#allocation2 + $0x70] sm:$0xff] (!%p868_p7), %vm236_vm0, %v1226_v0  ;;  %252 = vst.msk [vmem:[#allocation2 + $0x78] sm:$0xff] (!%p868_p7), %vm236_vm0, %v1226_v0 }
  0x46 PF: > { %v1108_v1 = vld [vmem:[%s1376_s29] sm:$0xff]   ;;  %v1109_v2 = vld [vmem:[%s1376_s29 + $0x8] sm:$0xff]   ;;  %v1110_v3 = vld [vmem:[%s1376_s29 + $0x10] sm:$0xff]   ;;  %vm510_vm1 = vcmask 261120   ;;  %p885_p6 = scmp.ne.s32.totalorder %s1204_s15, 1 }
  0x47   : > { %941 = vmatprep.subr.bf16.mxu0 %v1108_v1  ;;  %1013 = vmatprep.subr.bf16.mxu1 %v1108_v1  ;;  %v1111_v4 = vld [vmem:[%s1376_s29 + $0x18] sm:$0xff]   ;;  %v1116_v5 = vld [vmem:[%s1365_s30] sm:$0xff]   ;;  %v1113_v8 = vld [vmem:[%s1376_s29 + $0x28] sm:$0xff]   ;;  %vm744_vm2 = vcmask (!%p885_p6), 130048  }
  0x48   : > { %942 = vmatpush3.bf16.msra.mxu0 %v1108_v1  ;;  %1021 = vmatpush3.bf16.msra.mxu1 %v1108_v1  ;;  %v1117_v6 = vld [vmem:[%s1365_s30 + $0x20] sm:$0xff]   ;;  %v1114_v9 = vld [vmem:[%s1376_s29 + $0x30] sm:$0xff]   ;;  %v1115_v10 = vld [vmem:[%s1376_s29 + $0x38] sm:$0xff]  }
  0x49   : > { %943 = vmatprep.subr.bf16.mxu0 %v1109_v2  ;;  %1014 = vmatprep.subr.bf16.mxu1 %v1109_v2  ;;  %v1112_v7 = vld [vmem:[%s1376_s29 + $0x20] sm:$0xff]   ;;  %v1118_v11 = vld [vmem:[%s1365_s30 + $0x8] sm:$0xff]   ;;  %v1120_v13 = vld [vmem:[%s1365_s30 + $0x10] sm:$0xff]  }
  0x4a   : > { %957 = vmatprep.mubr.bf16.mxu0 %v1116_v5  ;;  %965 = vmatprep.mubr.bf16.mxu1 %v1117_v6  ;;  %v1119_v12 = vld [vmem:[%s1365_s30 + $0x28] sm:$0xff]   ;;  %v1121_v14 = vld [vmem:[%s1365_s30 + $0x30] sm:$0xff]   ;;  %v1122_v15 = vld [vmem:[%s1365_s30 + $0x18] sm:$0xff]  }
  0x4b   : > { %v1123_v16 = vld [vmem:[%s1365_s30 + $0x38] sm:$0xff]   ;;  %v255_v17 = vld [vmem:[#allocation2 + $0x10] sm:$0xff]  ;;  %v253_v19 = vld [vmem:[#allocation2] sm:$0xff] }
  0x4c   : > { %944 = vmatpush3.bf16.msra.mxu0 %v1109_v2  ;;  %1022 = vmatpush3.bf16.msra.mxu1 %v1109_v2  ;;  %v263_v18 = vld [vmem:[#allocation2 + $0x50] sm:$0xff]  ;;  %v261_v20 = vld [vmem:[#allocation2 + $0x40] sm:$0xff]  ;;  %v256_v23 = vld [vmem:[#allocation2 + $0x18] sm:$0xff] }
  0x4d   : > { %945 = vmatprep.subr.bf16.mxu0 %v1110_v3  ;;  %1015 = vmatprep.subr.bf16.mxu1 %v1110_v3  ;;  %v264_v24 = vld [vmem:[#allocation2 + $0x58] sm:$0xff]  ;;  %v254_v29 = vld [vmem:[#allocation2 + $0x8] sm:$0xff]  ;;  %v259_v41 = vld [vmem:[#allocation2 + $0x30] sm:$0xff] }
  0x4e   : > { %v262_v30 = vld [vmem:[#allocation2 + $0x48] sm:$0xff]  ;;  %v267_v42 = vld [vmem:[#allocation2 + $0x70] sm:$0xff]  ;;  %v257_v43 = vld [vmem:[#allocation2 + $0x20] sm:$0xff] }
  0x4f   : > { %v265_v44 = vld [vmem:[#allocation2 + $0x60] sm:$0xff]  ;;  %v260_v47 = vld [vmem:[#allocation2 + $0x38] sm:$0xff]  ;;  %v258_v53 = vld [vmem:[#allocation2 + $0x28] sm:$0xff] }
  0x50   : > { %946 = vmatpush3.bf16.msra.mxu0 %v1110_v3  ;;  %1023 = vmatpush3.bf16.msra.mxu1 %v1110_v3  ;;  %v268_v48 = vld [vmem:[#allocation2 + $0x78] sm:$0xff]  ;;  %v266_v54 = vld [vmem:[#allocation2 + $0x68] sm:$0xff]  ;;  %v547_v1 = vld [vmem:[%s1519_s2] sm:$0xff] (!%p885_p6) }
  0x51   : > { %947 = vmatprep.subr.bf16.mxu0 %v1111_v4  ;;  %1016 = vmatprep.subr.bf16.mxu1 %v1111_v4  ;;  %v548_v2 = vld [vmem:[%s1519_s2 + $0x8] sm:$0xff] (!%p885_p6)  ;;  %v549_v3 = vld [vmem:[%s1519_s2 + $0x10] sm:$0xff] (!%p885_p6)  ;;  %v550_v5 = vld [vmem:[%s1519_s2 + $0x18] sm:$0xff] (!%p885_p6) }
  0x54   : > { %948 = vmatpush3.bf16.msra.mxu0 %v1111_v4  ;;  %1024 = vmatpush3.bf16.msra.mxu1 %v1111_v4  ;;  %v1005_v4 = vpack.c.bf16 (!%p885_p6), %v548_v2, %v547_v1 }
  0x55   : > { %949 = vmatprep.subr.bf16.mxu0 %v1112_v7  ;;  %1017 = vmatprep.subr.bf16.mxu1 %v1112_v7 }
  0x58   : > { %950 = vmatpush3.bf16.msra.mxu0 %v1112_v7  ;;  %1025 = vmatpush3.bf16.msra.mxu1 %v1112_v7 }
  0x59   : > { %951 = vmatprep.subr.bf16.mxu0 %v1113_v8  ;;  %1018 = vmatprep.subr.bf16.mxu1 %v1113_v8 }
  0x5c   : > { %952 = vmatpush3.bf16.msra.mxu0 %v1113_v8  ;;  %1026 = vmatpush3.bf16.msra.mxu1 %v1113_v8  ;;  %v1009_v8 = vpack.c.bf16 (!%p885_p6), %v550_v5, %v549_v3 }
  0x5d   : > { %953 = vmatprep.subr.bf16.mxu0 %v1114_v9  ;;  %1019 = vmatprep.subr.bf16.mxu1 %v1114_v9 }
  0x60   : > { %954 = vmatpush3.bf16.msra.mxu0 %v1114_v9  ;;  %1027 = vmatpush3.bf16.msra.mxu1 %v1114_v9 }
  0x61   : > { %955 = vmatprep.subr.bf16.mxu0 %v1115_v10  ;;  %1020 = vmatprep.subr.bf16.mxu1 %v1115_v10 }
  0x64   : > { %956 = vmatpush3.bf16.msra.mxu0 %v1115_v10  ;;  %1028 = vmatpush3.bf16.msra.mxu1 %v1115_v10 }
  0x65   : > { %1006 = vmatprep.subr.bf16.mxu0 (!%p885_p6), %v1005_v4  ;;  %1029 = vmatprep.subr.bf16.mxu1 (!%p885_p6), %v1005_v4 }
  0x67   : > { %958 = vmatmul.mubr.bf16.vlgmr.msra.gmra.mrb[0].mxu0 %v1118_v11  ;;  %966 = vmatmul.mubr.bf16.vlgmr.msra.gmra.mrb[0].mxu1 %v1119_v12 }
  0x68   : > { %961 = vmatprep.mubr.bf16.mxu0 %v1120_v13  ;;  %969 = vmatprep.mubr.bf16.mxu1 %v1121_v14 }
  0x69   : > { %1008 = vmatpush3.bf16.msra.mxu0 (!%p885_p6), %v1005_v4  ;;  %1031 = vmatpush3.bf16.msra.mxu1 (!%p885_p6), %v1005_v4 }
  0x6a   : > { %1010 = vmatprep.subr.bf16.mxu0 (!%p885_p6), %v1009_v8  ;;  %1030 = vmatprep.subr.bf16.mxu1 (!%p885_p6), %v1009_v8 }
  0x6d   : > { %1012 = vmatpush3.bf16.msra.mxu0 (!%p885_p6), %v1009_v8  ;;  %1032 = vmatpush3.bf16.msra.mxu1 (!%p885_p6), %v1009_v8 }
  0x6f   : > { %962 = vmatmul.mubr.bf16.gmra.mrb[4].mxu0 %v1122_v15  ;;  %970 = vmatmul.mubr.bf16.gmra.mrb[4].mxu1 %v1123_v16 }
 0x13a   : > { %v959_v21 = vpop.f32.mrb[0].mxu0  ;;  %v967_v22 = vpop.f32.mrb[0].mxu1 }
 0x13b   : > { %v496_v25 = vadd.f32 %v959_v21, %v255_v17  ;;  %v504_v26 = vadd.f32 %v967_v22, %v263_v18  ;;  %v431_v27 = vpop.f32.mrb[1].mxu0  ;;  %v463_v28 = vpop.f32.mrb[1].mxu1 }
 0x13c   : > { %v494_v31 = vadd.f32 %v431_v27, %v253_v19  ;;  %v502_v32 = vadd.f32 %v463_v28, %v261_v20  ;;  %v960_v33 = vpop.f32.mrb[2].mxu0  ;;  %v968_v34 = vpop.f32.mrb[2].mxu1 }
 0x13d   : > { %513 = vst.msk [vmem:[#allocation2 + $0x10] sm:$0xff] %vm510_vm1, %v496_v25  ;;  %521 = vst.msk [vmem:[#allocation2 + $0x50] sm:$0xff] %vm510_vm1, %v504_v26  ;;  %v497_v35 = vadd.f32 %v960_v33, %v256_v23  ;;  %v505_v36 = vadd.f32 %v968_v34, %v264_v24  ;;  %v434_v37 = vpop.f32.mrb[3].mxu0  ;;  %v466_v38 = vpop.f32.mrb[3].mxu1 }
 0x13e   : > { %511 = vst.msk [vmem:[#allocation2] sm:$0xff] %vm510_vm1, %v494_v31  ;;  %519 = vst.msk [vmem:[#allocation2 + $0x40] sm:$0xff] %vm510_vm1, %v502_v32  ;;  %v495_v39 = vadd.f32 %v434_v37, %v254_v29  ;;  %v503_v40 = vadd.f32 %v466_v38, %v262_v30 }
 0x13f   : > { %514 = vst.msk [vmem:[#allocation2 + $0x18] sm:$0xff] %vm510_vm1, %v497_v35  ;;  %522 = vst.msk [vmem:[#allocation2 + $0x58] sm:$0xff] %vm510_vm1, %v505_v36 }
 0x140   : > { %512 = vst.msk [vmem:[#allocation2 + $0x8] sm:$0xff] %vm510_vm1, %v495_v39  ;;  %520 = vst.msk [vmem:[#allocation2 + $0x48] sm:$0xff] %vm510_vm1, %v503_v40 }
 0x142   : > { %v963_v45 = vpop.f32.mrb[4].mxu0  ;;  %v971_v46 = vpop.f32.mrb[4].mxu1  ;;  %530 = sbr.rel (%p885_p6) target bundleno = 555 (0x22b), region = 44 }
 0x143   : > { %v500_v49 = vadd.f32 %v963_v45, %v259_v41  ;;  %v508_v50 = vadd.f32 %v971_v46, %v267_v42  ;;  %v447_v51 = vpop.f32.mrb[5].mxu0  ;;  %v479_v52 = vpop.f32.mrb[5].mxu1 }
 0x144   : > { %v498_v55 = vadd.f32 %v447_v51, %v257_v43  ;;  %v506_v56 = vadd.f32 %v479_v52, %v265_v44  ;;  %v964_v57 = vpop.f32.mrb[6].mxu0  ;;  %v972_v58 = vpop.f32.mrb[6].mxu1  ;;  %v533_v11 = vld [vmem:[#allocation2 + $0x10] sm:$0xff] (!%p885_p6) }
 0x145   : > { %517 = vst.msk [vmem:[#allocation2 + $0x30] sm:$0xff] %vm510_vm1, %v500_v49  ;;  %525 = vst.msk [vmem:[#allocation2 + $0x70] sm:$0xff] %vm510_vm1, %v508_v50  ;;  %v501_v59 = vadd.f32 %v964_v57, %v260_v47  ;;  %v509_v60 = vadd.f32 %v972_v58, %v268_v48  ;;  %v450_v61 = vpop.f32.mrb[7].mxu0  ;;  %v482_v62 = vpop.f32.mrb[7].mxu1  ;;  %v531_v6 = vld [vmem:[#allocation2] sm:$0xff] (!%p885_p6)  ;;  %v541_v12 = vld [vmem:[#allocation2 + $0x50] sm:$0xff] (!%p885_p6) }
 0x146   : > { %515 = vst.msk [vmem:[#allocation2 + $0x20] sm:$0xff] %vm510_vm1, %v498_v55  ;;  %523 = vst.msk [vmem:[#allocation2 + $0x60] sm:$0xff] %vm510_vm1, %v506_v56  ;;  %v499_v63 = vadd.f32 %v450_v61, %v258_v53  ;;  %v507_v0 = vadd.f32 %v482_v62, %v266_v54  ;;  %v539_v7 = vld [vmem:[#allocation2 + $0x40] sm:$0xff] (!%p885_p6)  ;;  %981 = vmatprep.mubr.msk.f32.mxu0 (!%p885_p6), %vm510_vm1, %v531_v6  ;;  %v534_v13 = vld [vmem:[#allocation2 + $0x18] sm:$0xff] (!%p885_p6) }
 0x147   : > { %518 = vst.msk [vmem:[#allocation2 + $0x38] sm:$0xff] %vm510_vm1, %v501_v59  ;;  %526 = vst.msk [vmem:[#allocation2 + $0x78] sm:$0xff] %vm510_vm1, %v509_v60  ;;  %993 = vmatprep.mubr.msk.f32.mxu1 (!%p885_p6), %vm510_vm1, %v539_v7  ;;  %v532_v9 = vld [vmem:[#allocation2 + $0x8] sm:$0xff] (!%p885_p6)  ;;  %v542_v14 = vld [vmem:[#allocation2 + $0x58] sm:$0xff] (!%p885_p6) }
 0x148   : > { %516 = vst.msk [vmem:[#allocation2 + $0x28] sm:$0xff] %vm510_vm1, %v499_v63  ;;  %524 = vst.msk [vmem:[#allocation2 + $0x68] sm:$0xff] %vm510_vm1, %v507_v0  ;;  %v540_v10 = vld [vmem:[#allocation2 + $0x48] sm:$0xff] (!%p885_p6)  ;;  %982 = vmatmul.mubr.msk.f32.vlgmr.msra.gmra.mrb[0].mxu0 (!%p885_p6), %vm510_vm1, %v532_v9 }
 0x149   : > { %994 = vmatmul.mubr.msk.f32.vlgmr.msra.gmra.mrb[0].mxu1 %vm510_vm1, %v540_v10  ;;  %984 = vmatprep.mubr.msk.f32.mxu0 %vm510_vm1, %v533_v11 }
 0x14a   : > { %996 = vmatprep.mubr.msk.f32.mxu1 %vm510_vm1, %v541_v12 }
 0x14c   : > { %985 = vmatmul.mubr.msk.f32.gmra.mrb[2].mxu0 %vm510_vm1, %v534_v13  ;;  %v537_v19 = vld [vmem:[#allocation2 + $0x30] sm:$0xff] }
 0x14d   : > { %v535_v15 = vld [vmem:[#allocation2 + $0x20] sm:$0xff]  ;;  %997 = vmatmul.mubr.msk.f32.gmra.mrb[2].mxu1 %vm510_vm1, %v542_v14  ;;  %v545_v20 = vld [vmem:[#allocation2 + $0x70] sm:$0xff] }
 0x14e   : > { %v543_v16 = vld [vmem:[#allocation2 + $0x60] sm:$0xff]  ;;  %987 = vmatprep.mubr.msk.f32.mxu0 %vm510_vm1, %v535_v15  ;;  %v538_v21 = vld [vmem:[#allocation2 + $0x38] sm:$0xff] }
 0x14f   : > { %999 = vmatprep.mubr.msk.f32.mxu1 %vm510_vm1, %v543_v16  ;;  %v536_v17 = vld [vmem:[#allocation2 + $0x28] sm:$0xff]  ;;  %v546_v22 = vld [vmem:[#allocation2 + $0x78] sm:$0xff] }
 0x150   : > { %v544_v18 = vld [vmem:[#allocation2 + $0x68] sm:$0xff]  ;;  %988 = vmatmul.mubr.msk.f32.gmra.mrb[4].mxu0 %vm510_vm1, %v536_v17 }
 0x151   : > { %1000 = vmatmul.mubr.msk.f32.gmra.mrb[4].mxu1 %vm510_vm1, %v544_v18  ;;  %990 = vmatprep.mubr.msk.f32.mxu0 %vm510_vm1, %v537_v19 }
 0x152   : > { %1002 = vmatprep.mubr.msk.f32.mxu1 %vm510_vm1, %v545_v20 }
 0x154   : > { %991 = vmatmul.mubr.msk.f32.gmra.mrb[6].mxu0 %vm510_vm1, %v538_v21 }
 0x155   : > { %1003 = vmatmul.mubr.msk.f32.gmra.mrb[6].mxu1 %vm510_vm1, %v546_v22 }
 0x21b   : > { %v983_v23 = vpop.f32.mrb[0].mxu0 }
 0x21c   : > { %v995_v24 = vpop.f32.mrb[0].mxu1  ;;  %746 = vst.msk [vmem:[%s1381_s26 + $0x8] sm:$0xff] %vm744_vm2, %v983_v23  ;;  %v665_v25 = vpop.f32.mrb[1].mxu0 }
 0x21d   : > { %754 = vst.msk [vmem:[%s1381_s26 + $0x48] sm:$0xff] %vm744_vm2, %v995_v24  ;;  %v705_v26 = vpop.f32.mrb[1].mxu1  ;;  %745 = vst.msk [vmem:[%s1381_s26] sm:$0xff] %vm744_vm2, %v665_v25 }
 0x21e   : > { %753 = vst.msk [vmem:[%s1381_s26 + $0x40] sm:$0xff] %vm744_vm2, %v705_v26 }
 0x21f   : > { %v986_v27 = vpop.f32.mrb[2].mxu0 }
 0x220   : > { %v998_v28 = vpop.f32.mrb[2].mxu1  ;;  %748 = vst.msk [vmem:[%s1381_s26 + $0x18] sm:$0xff] %vm744_vm2, %v986_v27  ;;  %v675_v29 = vpop.f32.mrb[3].mxu0 }
 0x221   : > { %756 = vst.msk [vmem:[%s1381_s26 + $0x58] sm:$0xff] %vm744_vm2, %v998_v28  ;;  %v715_v30 = vpop.f32.mrb[3].mxu1  ;;  %747 = vst.msk [vmem:[%s1381_s26 + $0x10] sm:$0xff] %vm744_vm2, %v675_v29 }
 0x222   : > { %755 = vst.msk [vmem:[%s1381_s26 + $0x50] sm:$0xff] %vm744_vm2, %v715_v30 }
 0x223   : > { %v989_v31 = vpop.f32.mrb[4].mxu0 }
 0x224   : > { %v1001_v32 = vpop.f32.mrb[4].mxu1  ;;  %750 = vst.msk [vmem:[%s1381_s26 + $0x28] sm:$0xff] %vm744_vm2, %v989_v31  ;;  %v685_v33 = vpop.f32.mrb[5].mxu0 }
 0x225   : > { %758 = vst.msk [vmem:[%s1381_s26 + $0x68] sm:$0xff] %vm744_vm2, %v1001_v32  ;;  %v725_v34 = vpop.f32.mrb[5].mxu1  ;;  %749 = vst.msk [vmem:[%s1381_s26 + $0x20] sm:$0xff] %vm744_vm2, %v685_v33 }
 0x226   : > { %757 = vst.msk [vmem:[%s1381_s26 + $0x60] sm:$0xff] %vm744_vm2, %v725_v34 }
 0x227   : > { %v992_v35 = vpop.f32.mrb[6].mxu0 }
 0x228   : > { %v1004_v36 = vpop.f32.mrb[6].mxu1  ;;  %752 = vst.msk [vmem:[%s1381_s26 + $0x38] sm:$0xff] %vm744_vm2, %v992_v35  ;;  %v695_v37 = vpop.f32.mrb[7].mxu0 }
 0x229   : > { %760 = vst.msk [vmem:[%s1381_s26 + $0x78] sm:$0xff] %vm744_vm2, %v1004_v36  ;;  %v735_v38 = vpop.f32.mrb[7].mxu1  ;;  %751 = vst.msk [vmem:[%s1381_s26 + $0x30] sm:$0xff] %vm744_vm2, %v695_v37 }
 0x22a   : > { %759 = vst.msk [vmem:[%s1381_s26 + $0x70] sm:$0xff] %vm744_vm2, %v735_v38 }
 0x22b PF: > { %s16_s19 = sadd.s32 1, %s1220_s19   ;;  %s1525_s12 = smov %s1196_s13 }
 0x22c   : > { %p13_p8 = scmp.ge.s32.totalorder %s16_s19, 6   ;;  %s1526_s13 = smov %s1200_s14 }
 0x22d   : > { %s1527_s14 = smov %s1314_s5  ;;  %s1528_s15 = smov %s1212_s17 }
 0x22e   : > { %s1529_s16 = smov %s1216_s18  ;;  %s1530_s17 = smov %s1533_s21 }
 0x22f   : > { %s1531_s18 = smov %s1537_s22  ;;  %15 = sbr.rel (!%p13_p8) target bundleno = 5 (0x5), region = 83 }
 0x236   :  { %783 = vsyncpa [#allocation4], 1 }
 0x237   :  { %785 = vsyncpa [#allocation4 + $0x1], 1 }

</bundles_post_ra>
